<compile_context>
chip_gen: v7x
topology: tpu7x:2x2x1
jax: 0.10.0
libtpu: 0.0.40
codegen_flags: <defaults>
</compile_context>

<pallas_src>
import functools

import jax
import jax.numpy as jnp
from jax.experimental import pallas as pl
from jax.experimental.pallas import tpu as pltpu


# ----------------------------- config --------------------------------------
class SiglipVisionConfig:
    def __init__(self,
                 hidden_size=768,
                 intermediate_size=3072,
                 num_hidden_layers=12,
                 num_attention_heads=12,
                 num_channels=3,
                 image_size=224,
                 patch_size=16,
                 layer_norm_eps=1e-12,
                 attention_dropout=0.0,
                 num_image_tokens=None,
                 **kwargs):
        self.hidden_size = hidden_size
        self.intermediate_size = intermediate_size
        self.num_hidden_layers = num_hidden_layers
        self.num_attention_heads = num_attention_heads
        self.num_channels = num_channels
        self.image_size = image_size
        self.patch_size = patch_size
        self.layer_norm_eps = layer_norm_eps
        self.attention_dropout = attention_dropout
        self.num_image_tokens = num_image_tokens


# ----------------------------- helpers --------------------------------------
def _vmem_limit_bytes(frac=0.85, fallback=64 * 1024 * 1024):
    """Per-generation VMEM limit: ~54 MiB on v7x (64 MiB phys), ~109 MiB on
    v5e/v6e (128 MiB phys).  Conservative fallback if the query fails."""
    try:
        return int(pltpu.get_tpu_info().vmem_capacity_bytes * frac)
    except Exception:
        return fallback


def _layer_norm(x, gamma, beta, eps):
    # One-pass statistics; clamp var >= 0 (E[x^2]-E[x]^2 can cancel in f32).
    mu = jnp.mean(x, axis=-1, keepdims=True)
    var = jnp.maximum(jnp.mean(x * x, axis=-1, keepdims=True) - mu * mu, 0.0)
    return (x - mu) * jax.lax.rsqrt(var + eps) * gamma + beta


def _pick_f_tile(F, target=1024):
    """Largest multiple-of-128 divisor of F that is <= target (else F)."""
    if F <= target:
        return F
    t = (target // 128) * 128
    while t >= 128:
        if F % t == 0:
            return t
        t -= 128
    return F


# ----------------------------- embedding kernel -----------------------------
def _embed_kernel(patches_ref, w_ref, b_ref, pos_ref, out_ref):
    B, S, K = patches_ref.shape
    D = out_ref.shape[-1]
    p = patches_ref[...].reshape(B * S, K).astype(jnp.bfloat16)
    emb = jnp.dot(p, w_ref[...], preferred_element_type=jnp.float32) + b_ref[...]
    out_ref[...] = emb.reshape(B, S, D) + pos_ref[...][None]


# ----------------------------- encoder kernel -------------------------------
def _encoder_kernel(emb_ref, ln1g_ref, ln1b_ref, wqkv_ref, bqkv_ref,
                    wo_ref, bo_ref, ln2g_ref, ln2b_ref,
                    w1_ref, b1_ref, w2_ref, b2_ref,
                    postg_ref, postb_ref,
                    out_ref,
                    x_ref, h2_ref, acc_ref,
                    *, num_heads, eps):
    l = pl.program_id(0)
    fi = pl.program_id(1)
    num_layers = pl.num_programs(0)
    num_f_tiles = pl.num_programs(1)

    B, S, D = out_ref.shape
    H = num_heads
    hd = D // H
    M = B * S
    scale = hd ** -0.5
    bf16 = jnp.bfloat16

    # ---- seed the resident hidden state from the embedding (first step) ----
    @pl.when(jnp.logical_and(l == 0, fi == 0))
    def _():
        x_ref[...] = emb_ref[...]

    # ---- per-layer work independent of the F tile (attention + LN2) --------
    @pl.when(fi == 0)
    def _():
        x = x_ref[...]                                          # [B, S, D] f32

        # attention block (pre-LN), fused QKV projection
        h = _layer_norm(x, ln1g_ref[...][None], ln1b_ref[...][None], eps)
        h2d = h.reshape(M, D).astype(bf16)
        qkv = jnp.dot(h2d, wqkv_ref[...],
                      preferred_element_type=jnp.float32) + bqkv_ref[...]
        q2d = qkv[:, :D] * scale          # scale q (MxD), not the S^2 scores
        k2d = qkv[:, D:2 * D]
        v2d = qkv[:, 2 * D:]

        # Head-streamed attention: only one head's (B,S,S) scores are live and
        # the per-head out-projection slab folds the head merge (no transposes
        # or concatenates in the kernel).
        # TODO(synk): for production shapes add KV-tile online softmax and pad
        # head_dim to 128 for fully lane-aligned head slices.
        attn2d = jnp.zeros((M, D), jnp.float32)
        for h_idx in range(H):
            sl = slice(h_idx * hd, (h_idx + 1) * hd)
            qh = q2d[:, sl].reshape(B, S, hd).astype(bf16)
            kh = k2d[:, sl].reshape(B, S, hd).astype(bf16)
            vh = v2d[:, sl].reshape(B, S, hd).astype(bf16)
            s = jnp.einsum('bqd,bkd->bqk', qh, kh,
                           preferred_element_type=jnp.float32)
            s = s - jnp.max(s, axis=-1, keepdims=True)
            e = jnp.exp(s)
            p = (e * pl.reciprocal(jnp.sum(e, axis=-1, keepdims=True),
                                   approx=True)).astype(bf16)
            ctx = jnp.einsum('bqk,bkd->bqd', p, vh,
                             preferred_element_type=jnp.float32)
            attn2d = attn2d + jnp.dot(ctx.reshape(M, hd).astype(bf16),
                                      wo_ref[sl, :],
                                      preferred_element_type=jnp.float32)
        x = x + (attn2d + bo_ref[...]).reshape(B, S, D)          # residual 1
        x_ref[...] = x

        # pre-MLP LayerNorm, held in bf16 scratch across the F tiles
        h2 = _layer_norm(x, ln2g_ref[...][None], ln2b_ref[...][None], eps)
        h2_ref[...] = h2.astype(bf16)
        acc_ref[...] = jnp.zeros_like(acc_ref)

    # ---- MLP F tile: acc += gelu(h2 @ w1_f + b1_f) @ w2_f -------------------
    h2d = h2_ref[...].reshape(M, D)
    m1 = jnp.dot(h2d, w1_ref[...], preferred_element_type=jnp.float32) + b1_ref[...]
    # tanh GELU routes the transcendental to the EUP slot (perf review, v5e);
    # deviation from torch's exact-erf F.gelu is ~1e-3 max.
    m1 = jax.nn.gelu(m1, approximate=True)
    m2 = jnp.dot(m1.astype(bf16), w2_ref[...], preferred_element_type=jnp.float32)
    acc_ref[...] += m2.reshape(B, S, D)

    # ---- layer finalize / final post-LN -------------------------------------
    @pl.when(fi == num_f_tiles - 1)
    def _():
        x_ref[...] = x_ref[...] + acc_ref[...] + b2_ref[...][None]   # residual 2

    @pl.when(jnp.logical_and(fi == num_f_tiles - 1, l == num_layers - 1))
    def _():
        out_ref[...] = _layer_norm(x_ref[...], postg_ref[...][None],
                                   postb_ref[...][None], eps)


# ----------------------------- wrappers --------------------------------------
def extract_patches(pixel_values, patch_size):
    """NCHW -> [B, num_patches, C*P*P], matching a stride==kernel Conv2d whose
    weight is flattened to [C*P*P, D] (pure reshape/transpose glue in XLA)."""
    B, C, Hh, Ww = pixel_values.shape
    P = patch_size
    Hp, Wp = Hh // P, Ww // P
    x = pixel_values.reshape(B, C, Hp, P, Wp, P)
    x = jnp.transpose(x, (0, 2, 4, 1, 3, 5))                 # [B, Hp, Wp, C, P, P]
    return x.reshape(B, Hp * Wp, C * P * P)


def siglip_vision_transformer(pixel_values, params, config):
    B = pixel_values.shape[0]
    D = config.hidden_size
    F = config.intermediate_size
    P = config.patch_size
    N = (config.image_size // P) ** 2
    L = config.num_hidden_layers
    bf16 = jnp.bfloat16

    # ---------------- patch + position embedding (own tiny kernel) -----------
    patches = extract_patches(pixel_values, P)                # [B, N, C*P*P]
    embedded = pl.pallas_call(
        _embed_kernel,
        out_shape=jax.ShapeDtypeStruct((B, N, D), jnp.float32),
    )(patches, params['patch_w'].astype(bf16), params['patch_b'],
      params['pos_emb'])

    # ---------------- stacked / fused per-layer weights ----------------------
    def stack(name, dtype=jnp.float32):
        return jnp.stack([lp[name] for lp in params['layers']]).astype(dtype)

    # fused QKV: one (D, 3D) matmul instead of three (D, D) matmuls
    wqkv = jnp.stack([jnp.concatenate([lp['wq'], lp['wk'], lp['wv']], axis=-1)
                      for lp in params['layers']]).astype(bf16)
    bqkv = jnp.stack([jnp.concatenate([lp['bq'], lp['bk'], lp['bv']], axis=-1)
                      for lp in params['layers']])

    tf = _pick_f_tile(F)
    nf = F // tf

    layer_inputs = [
        stack('ln1_g'), stack('ln1_b'),
        wqkv, bqkv,
        stack('wo', bf16), stack('bo'),
        stack('ln2_g'), stack('ln2_b'),
        stack('w1', bf16), stack('b1'),
        stack('w2', bf16), stack('b2'),
    ]

    def const_spec(shape):          # same block every grid step
        nd = len(shape)
        return pl.BlockSpec(shape, lambda l, f, _n=nd: (0,) * _n)

    def layer_spec(shape):          # array is [L, *shape]; pick layer l, squeeze L
        nd = len(shape)
        return pl.BlockSpec((None,) + shape, lambda l, f, _n=nd: (l,) + (0,) * _n)

    in_specs = [
        const_spec((B, N, D)),                                 # embedded hidden
        layer_spec((1, D)), layer_spec((1, D)),                # ln1 g/b
        layer_spec((D, 3 * D)), layer_spec((1, 3 * D)),        # fused qkv w/b
        layer_spec((D, D)), layer_spec((1, D)),                # out proj w/b
        layer_spec((1, D)), layer_spec((1, D)),                # ln2 g/b
        pl.BlockSpec((None, D, tf), lambda l, f: (l, 0, f)),   # fc1 weight tile
        pl.BlockSpec((None, 1, tf), lambda l, f: (l, 0, f)),   # fc1 bias tile
        pl.BlockSpec((None, tf, D), lambda l, f: (l, f, 0)),   # fc2 weight tile
        layer_spec((1, D)),                                    # fc2 bias
        const_spec((1, D)), const_spec((1, D)),                # post-LN g/b
    ]
    out_spec = pl.BlockSpec((B, N, D), lambda l, f: (0, 0, 0))  # written last step

    kernel = functools.partial(_encoder_kernel,
                               num_heads=config.num_attention_heads,
                               eps=config.layer_norm_eps)

    # TODO(synk): for production SigLIP shapes, additionally tile the token axis
    # (online softmax over KV tiles) and alias `embedded` onto the output block
    # via input_output_aliases so it is not VMEM-resident for all layers.
    fn = pl.pallas_call(
        kernel,
        grid=(L, nf),
        in_specs=in_specs,
        out_specs=out_spec,
        out_shape=jax.ShapeDtypeStruct((B, N, D), jnp.float32),
        scratch_shapes=[
            pltpu.VMEM((B, N, D), jnp.float32),   # resident hidden state
            pltpu.VMEM((B, N, D), bf16),          # LN2(x), reused across F tiles
            pltpu.VMEM((B, N, D), jnp.float32),   # MLP accumulator
        ],
        compiler_params=pltpu.CompilerParams(
            dimension_semantics=("arbitrary", "arbitrary"),
            vmem_limit_bytes=_vmem_limit_bytes()),
    )
    return fn(embedded, *layer_inputs, params['post_ln_g'], params['post_ln_b'])


# ----------------------------- param init ------------------------------------
def init_params(config, key):
    D = config.hidden_size
    F = config.intermediate_size
    P = config.patch_size
    N = (config.image_size // P) ** 2
    K = config.num_channels * P * P

    def nrm(k, shape, scale=0.02):
        return jax.random.normal(k, shape, jnp.float32) * scale

    keys = jax.random.split(key, 4 + config.num_hidden_layers)
    params = {
        'patch_w': nrm(keys[0], (K, D)),
        'patch_b': nrm(keys[1], (1, D)),
        'pos_emb': nrm(keys[2], (N, D)),
        'post_ln_g': jnp.ones((1, D), jnp.float32),
        'post_ln_b': jnp.zeros((1, D), jnp.float32),
        'layers': [],
    }
    for li in range(config.num_hidden_layers):
        lk = jax.random.split(keys[4 + li], 12)
        params['layers'].append({
            'ln1_g': jnp.ones((1, D), jnp.float32),
            'ln1_b': jnp.zeros((1, D), jnp.float32),
            'wq': nrm(lk[0], (D, D)), 'bq': nrm(lk[1], (1, D)),
            'wk': nrm(lk[2], (D, D)), 'bk': nrm(lk[3], (1, D)),
            'wv': nrm(lk[4], (D, D)), 'bv': nrm(lk[5], (1, D)),
            'wo': nrm(lk[6], (D, D)), 'bo': nrm(lk[7], (1, D)),
            'ln2_g': jnp.ones((1, D), jnp.float32),
            'ln2_b': jnp.zeros((1, D), jnp.float32),
            'w1': nrm(lk[8], (D, F)), 'b1': nrm(lk[9], (1, F)),
            'w2': nrm(lk[10], (F, D)), 'b2': nrm(lk[11], (1, D)),
        })
    return params


# ----------------------------- main -------------------------------------------
if __name__ == "__main__":
    cfg = SiglipVisionConfig(
        hidden_size=128,            # lane-aligned small demo shapes
        intermediate_size=256,
        num_hidden_layers=2,
        num_attention_heads=4,      # head_dim = 32
        num_channels=3,
        image_size=16,
        patch_size=4,               # 16 patches -> sublane aligned
        layer_norm_eps=1e-12,
    )
    key = jax.random.PRNGKey(0)
    pkey, xkey = jax.random.split(key)
    params = init_params(cfg, pkey)

    pixel_values = jax.random.normal(
        xkey, (2, cfg.num_channels, cfg.image_size, cfg.image_size), jnp.float32)

    out = siglip_vision_transformer(pixel_values, params, cfg)
    out = jax.block_until_ready(out)
    n_patches = (cfg.image_size // cfg.patch_size) ** 2
    assert out.shape == (2, n_patches, cfg.hidden_size), out.shape
    assert bool(jnp.all(jnp.isfinite(out)))
    print("KERNEL_OK")
</pallas_src>

<mosaic_0001>
module attributes {stable_mosaic.version = 11 : i64} {
  func.func @_embed_kernel(%arg0: memref<2x16x48xf32, #tpu.memory_space<vmem>>, %arg1: memref<48x128xbf16, #tpu.memory_space<vmem>>, %arg2: memref<1x128xf32, #tpu.memory_space<vmem>>, %arg3: memref<16x128xf32, #tpu.memory_space<vmem>>, %arg4: memref<2x16x128xf32, #tpu.memory_space<vmem>>) attributes {dimension_semantics = [], scalar_prefetch = 0 : i64, scratch_operands = 0 : i64, tpu.core_type = #tpu.core_type<tc>} {
    %c0 = arith.constant 0 : index
    %c0_0 = arith.constant 0 : index
    %c0_1 = arith.constant 0 : index
    %0 = vector.load %arg0[%c0, %c0_0, %c0_1] : memref<2x16x48xf32, #tpu.memory_space<vmem>>, vector<2x16x48xf32>
    %1 = vector.shape_cast %0 : vector<2x16x48xf32> to vector<32x48xf32>
    %2 = arith.truncf %1 : vector<32x48xf32> to vector<32x48xbf16>
    %c0_2 = arith.constant 0 : index
    %c0_3 = arith.constant 0 : index
    %3 = vector.load %arg1[%c0_2, %c0_3] : memref<48x128xbf16, #tpu.memory_space<vmem>>, vector<48x128xbf16>
    %cst = arith.constant dense<0.000000e+00> : vector<32x128xf32>
    %4 = tpu.matmul %2, %3, %cst {dimension_numbers = #tpu.dot_dimension_numbers<[1], [0], [0], [1], [0, 0, 1, 1], [], []>} : vector<32x48xbf16>, vector<48x128xbf16>, vector<32x128xf32> -> vector<32x128xf32>
    %c0_4 = arith.constant 0 : index
    %c0_5 = arith.constant 0 : index
    %5 = vector.load %arg2[%c0_4, %c0_5] : memref<1x128xf32, #tpu.memory_space<vmem>>, vector<1x128xf32>
    %6 = vector.broadcast %5 : vector<1x128xf32> to vector<32x128xf32>
    %7 = arith.addf %4, %6 : vector<32x128xf32>
    %8 = vector.shape_cast %7 : vector<32x128xf32> to vector<2x16x128xf32>
    %c0_6 = arith.constant 0 : index
    %c0_7 = arith.constant 0 : index
    %9 = vector.load %arg3[%c0_6, %c0_7] : memref<16x128xf32, #tpu.memory_space<vmem>>, vector<16x128xf32>
    %10 = vector.shape_cast %9 : vector<16x128xf32> to vector<1x16x128xf32>
    %11 = vector.broadcast %10 : vector<1x16x128xf32> to vector<2x16x128xf32>
    %12 = arith.addf %8, %11 : vector<2x16x128xf32>
    %c0_8 = arith.constant 0 : index
    %c0_9 = arith.constant 0 : index
    %c0_10 = arith.constant 0 : index
    %13 = vector.load %arg4[%c0_8, %c0_9, %c0_10] : memref<2x16x128xf32, #tpu.memory_space<vmem>>, vector<2x16x128xf32>
    tpu.vector_store %arg4[%c0_8, %c0_9, %c0_10], %12 {strides = array<i32>} : memref<2x16x128xf32, #tpu.memory_space<vmem>>, vector<2x16x128xf32>,
    return
  }
}

</mosaic_0001>

<bundles_post_ra>
// kernel: tpu_custom_call.1
= control target key start
LH: loop header
LB: loop body
LE: loop exit
PB: predicated region body
PF: predicated region fallthrough
CT: control target
= control target key end

     0   :  { %9 = vsyncpa [#allocation3], 0  ;;  %s400_s0 = inlined_call_operand.hbm [shape: f32[2,16,48], index: 0, kind: input, shape index: {}]   ;;  %s401_s1 = inlined_call_operand.hbm [shape: bf16[48,128], index: 1, kind: input, shape index: {}]   ;;  %s402_s2 = inlined_call_operand.vmem [shape: f32[1,128], index: 2, kind: input, shape index: {}]   ;;  %s403_s3 = inlined_call_operand.hbm [shape: f32[16,128], index: 3, kind: input, shape index: {}]   ;;  %s404_s4 = inlined_call_operand.hbm [shape: f32[2,16,128], index: 4, kind: output, shape index: {}]  }
   0x1   :  { %10 = vsyncpa [#allocation6], 0 }
   0x2   :  { %11 = vsyncpa [#allocation4], 0  ;;  %s307_s15 = smov [#allocation5]   ;;  %s213_s19 = scalar_lea.hbm %s401_s1, 384 }
   0x3   :  { %s29_s16 = sshll.u32 %s307_s15, 4  ;;  %p214_p0 = scmp.ne.s32.totalorder %s401_s1, %s213_s19  ;;  %s30_s16 = int_to_ptr.vmem [resolvable:$true] %s29_s16 }
   0x4   :  { %p217_p1 = scmp.lt.u32.totalorder %s213_s19, %s401_s1 }
   0x6   :  { %p219_p2 = pnand %p217_p1, %p214_p0 }
   0x8   :  { %222 = shalt.err (!%p219_p2)
}
   0x9   :  { %s223_s24 = scalar_lea.vmem %s30_s16, 384  ;;  %p228_p4 = scmp.lt.s32.totalorder %s30_s16, %s30_s16 }
   0xa   :  { %p224_p3 = scmp.ne.s32.totalorder %s30_s16, %s223_s24  ;;  %p229_p5 = scmp.lt.s32.totalorder %s223_s24, %s223_s24 }
   0xc   :  { %p230_p6 = por %p229_p5, %p228_p4 }
   0xe   :  { %p231_p7 = pnand %p230_p6, %p224_p3 }
  0x10   :  { %234 = shalt.err (!%p231_p7)
}
  0x11   :  { %s308_s25 = smov 64   ;;  %s309_s26 = smov 4  }
  0x12   :  { %35 = dma.hbm_to_vmem [thread:$0]  %s401_s1, 384, %s30_s16, [#allocation6], %s308_s25, %s308_s25, %s309_s26  }
  0x13   :  { %s310_s29 = smov [#allocation2]   ;;  %s235_s7 = scalar_lea.hbm %s400_s0, 512 }
  0x14   :  { %s17_s30 = sshll.u32 %s310_s29, 4  ;;  %p236_p8 = scmp.ne.s32.totalorder %s400_s0, %s235_s7  ;;  %s18_s30 = int_to_ptr.vmem [resolvable:$true] %s17_s30 }
  0x15   :  { %p239_p9 = scmp.lt.u32.totalorder %s235_s7, %s400_s0 }
  0x17   :  { %p241_p10 = pnand %p239_p9, %p236_p8 }
  0x19   :  { %244 = shalt.err (!%p241_p10)
}
  0x1a   :  { %s245_s12 = scalar_lea.vmem %s18_s30, 512  ;;  %p250_p12 = scmp.lt.s32.totalorder %s18_s30, %s18_s30 }
  0x1b   :  { %p246_p11 = scmp.ne.s32.totalorder %s18_s30, %s245_s12  ;;  %p251_p13 = scmp.lt.s32.totalorder %s245_s12, %s245_s12 }
  0x1d   :  { %p252_p0 = por %p251_p13, %p250_p12 }
  0x1f   :  { %p253_p1 = pnand %p252_p0, %p246_p11 }
  0x21   :  { %256 = shalt.err (!%p253_p1)
}
  0x22   :  { %s311_s1 = smov 128   ;;  %s312_s13 = smov 8  }
  0x23   :  { %23 = dma.hbm_to_vmem [thread:$0]  %s400_s0, 512, %s18_s30, [#allocation3], %s311_s1, %s311_s1, %s312_s13  }
  0x24   :  { %s313_s16 = smov [#allocation7]   ;;  %s257_s20 = scalar_lea.hbm %s403_s3, 256 }
  0x25   :  { %s43_s17 = sshll.u32 %s313_s16, 4  ;;  %p258_p2 = scmp.ne.s32.totalorder %s403_s3, %s257_s20  ;;  %s44_s17 = int_to_ptr.vmem [resolvable:$true] %s43_s17 }
  0x26   :  { %p261_p3 = scmp.lt.u32.totalorder %s257_s20, %s403_s3 }
  0x28   :  { %p263_p4 = pnand %p261_p3, %p258_p2 }
  0x2a   :  { %266 = shalt.err (!%p263_p4)
}
  0x2b   :  { %s267_s25 = scalar_lea.vmem %s44_s17, 256  ;;  %p272_p6 = scmp.lt.s32.totalorder %s44_s17, %s44_s17 }
  0x2c   :  { %p268_p5 = scmp.ne.s32.totalorder %s44_s17, %s267_s25  ;;  %p273_p7 = scmp.lt.s32.totalorder %s267_s25, %s267_s25 }
  0x2e   :  { %p274_p8 = por %p273_p7, %p272_p6 }
  0x30   :  { %p275_p9 = pnand %p274_p8, %p268_p5 }
  0x32   :  { %278 = shalt.err (!%p275_p9)
}
  0x33   :  { %49 = dma.hbm_to_vmem [thread:$0]  %s403_s3, 256, %s44_s17, [#allocation6], %s311_s1, %s311_s1, %s312_s13  }
  0x34   :  { %301 = dma.done.wait [#allocation3], 512  }
  0x35   :  { %302 = vsyncadd [#allocation3], 4294966784 }
  0x36   :  { %303 = dma.done.wait [#allocation6], 640  }
  0x37   :  { %304 = vsyncadd [#allocation6], 4294966656  ;;  %v210_v0 = vld [vmem:[#allocation5] sm:$0xff]   ;;  %v211_v1 = vld [vmem:[#allocation5 + $0x8] sm:$0xff]   ;;  %vm97_vm0 = vcmask 392192   ;;  %s314_s28 = smov [#allocation8]  }
  0x38   :  { %192 = vmatprep.subr.bf16.mxu0 %v210_v0  ;;  %v60_v2 = vld [vmem:[#allocation2] sm:$0xff]  ;;  %v61_v3 = vld [vmem:[#allocation2 + $0x8] sm:$0xff]  ;;  %v212_v4 = vld [vmem:[#allocation5 + $0x10] sm:$0xff]   ;;  %s168_s29 = sshll.u32 %s314_s28, 4  ;;  %s169_s29 = int_to_ptr.vmem [resolvable:$true] %s168_s29 }
  0x39   :  { %193 = vmatpush3.bf16.msra.mxu0 %v210_v0  ;;  %v64_v5 = vpack.c.bf16 %v61_v3, %v60_v2  ;;  %v62_v6 = vld [vmem:[#allocation2 + $0x10] sm:$0xff]  ;;  %v63_v7 = vld [vmem:[#allocation2 + $0x18] sm:$0xff]  ;;  %v181_v9 = vld [vmem:[%s402_s2] ss:$0 sm:$0xff]  ;;  %s279_s2 = scalar_lea.vmem %s169_s29, 512  ;;  %p284_p11 = scmp.lt.s32.totalorder %s169_s29, %s169_s29 }
  0x3a   :  { %194 = vmatprep.subr.bf16.mxu0 %v211_v1  ;;  %v65_v8 = vpack.c.bf16 %v63_v7, %v62_v6  ;;  %v153_v11 = vld [vmem:[#allocation7] sm:$0xff]  ;;  %v154_v16 = vld [vmem:[#allocation7 + $0x8] sm:$0xff]  ;;  %p280_p10 = scmp.ne.s32.totalorder %s169_s29, %s279_s2  ;;  %p285_p12 = scmp.lt.s32.totalorder %s279_s2, %s279_s2 }
  0x3b   :  { %198 = vmatprep.mubr.msk.bf16.mxu0 %vm97_vm0, %v64_v5 }
  0x3c   :  { %p286_p13 = por %p285_p12, %p284_p11 }
  0x3d   :  { %195 = vmatpush3.bf16.msra.mxu0 %v211_v1 }
  0x3e   :  { %196 = vmatprep.subr.bf16.mxu0 %v212_v4  ;;  %p287_p0 = pnand %p286_p13, %p280_p10 }
  0x41   :  { %197 = vmatpush3.bf16.msra.mxu0 %v212_v4 }
  0x44   :  { %199 = vmatmul.mubr.msk.bf16.vlgmr.msra.gmra.mrb[0].mxu0 %vm97_vm0, %v65_v8 }
 0x117   :  { %v200_v10 = vpop.f32.mrb[0].mxu0 }
 0x118   :  { %v147_v12 = vadd.f32 %v200_v10, %v181_v9  ;;  %v138_v13 = vpop.f32.mrb[1].mxu0 }
 0x119   :  { %v139_v14 = vadd.f32 %v181_v9, %v138_v13  ;;  %v201_v15 = vpop.f32.mrb[2].mxu0 }
 0x11a   :  { %v157_v17 = vadd.f32 %v153_v11, %v147_v12  ;;  %v150_v18 = vadd.f32 %v201_v15, %v181_v9  ;;  %v141_v19 = vpop.f32.mrb[3].mxu0 }
 0x11b   :  { %v155_v20 = vadd.f32 %v153_v11, %v139_v14  ;;  %v142_v21 = vadd.f32 %v181_v9, %v141_v19 }
 0x11c   :  { %161 = vst [vmem:[#allocation8 + $0x10] sm:$0xff] %v157_v17  ;;  %v158_v22 = vadd.f32 %v154_v16, %v150_v18 }
 0x11d   :  { %159 = vst [vmem:[#allocation8] sm:$0xff] %v155_v20  ;;  %v156_v23 = vadd.f32 %v154_v16, %v142_v21 }
 0x11e   :  { %162 = vst [vmem:[#allocation8 + $0x18] sm:$0xff] %v158_v22 }
 0x11f   :  { %160 = vst [vmem:[#allocation8 + $0x8] sm:$0xff] %v156_v23 }
 0x120   :  { %290 = shalt.err (!%p287_p0)
}
 0x121   :  { %s291_s6 = scalar_lea.hbm %s404_s4, 512 }
 0x122   :  { %p292_p1 = scmp.ne.s32.totalorder %s404_s4, %s291_s6  ;;  %p295_p2 = scmp.lt.u32.totalorder %s291_s6, %s404_s4 }
 0x124   :  { %p297_p3 = pnand %p295_p2, %p292_p1 }
 0x126   :  { %300 = shalt.err (!%p297_p3)
}
 0x127   :  { %174 = dma.vmem_to_hbm [thread:$0]  %s169_s29, 512, %s404_s4, [#allocation4], %s311_s1, %s311_s1, %s312_s13  }
 0x128   :  { %305 = dma.done.wait [#allocation4], 512  }
 0x129   :  { %306 = vsyncadd [#allocation4], 4294966784 }
 0x12a   :  { %178 = vsyncpa [#allocation3], 1 }
 0x12b   :  { %179 = vsyncpa [#allocation6], 1 }
 0x12c   :  { %180 = vsyncpa [#allocation4], 1 }

</bundles_post_ra>
